<compile_context>
chip_gen: v6e
topology: v6e:2x2x1
jax: 0.10.0
libtpu: 0.0.40
codegen_flags: <defaults>
</compile_context>

<pallas_src>
import math
import string
import numpy as np
import jax
import jax.numpy as jnp
from jax.experimental import pallas as pl
from jax.experimental.pallas import tpu as pltpu


def _round_up(x: int, m: int) -> int:
    return ((x + m - 1) // m) * m


def _divisor_tile(dim: int, cap: int) -> int:
    """Largest multiple of 128 that divides `dim` (dim % 128 == 0) and is <= cap."""
    t = max(128, (min(dim, cap) // 128) * 128)
    while dim % t != 0:
        t -= 128
    return t


def _merge_ring_weights(factors, core, out_factor):
    """Collapse the weight-only ring tensor network into one (S, F) matrix.

    factors[i]: (s_i, a_i, a_{(i+1) % n}, r_i)   (a_* are the ring link edges)
    core:       (r_0, ..., r_{n-1}, Q)
    out_factor: (Q, F) or None (then Q == F)

    Exact by associativity: every merged tensor is input-independent.
    """
    n = len(factors)
    letters = string.ascii_letters  # TODO(synk): breaks for > ~17 ring factors
    s_idx = [letters[i] for i in range(n)]
    a_idx = [letters[n + i] for i in range(n)]
    r_idx = [letters[2 * n + i] for i in range(n)]
    terms = [s_idx[i] + a_idx[i] + a_idx[(i + 1) % n] + r_idx[i] for i in range(n)]
    eq = ",".join(terms) + "->" + "".join(s_idx) + "".join(r_idx)
    M = jnp.einsum(eq, *factors)                      # (s_0..s_{n-1}, r_0..r_{n-1})
    S = int(np.prod([f.shape[0] for f in factors]))
    R = int(np.prod([f.shape[-1] for f in factors]))
    Q = core.shape[-1]
    W = M.reshape(S, R) @ core.reshape(R, Q)          # (S, Q)
    if out_factor is not None:
        W = W @ out_factor                            # (S, F)
    return W


def merge_trl_ringed_weights(factors, core, out_factor, bias,
                             *, compute_dtype=jnp.float32):
    """Build the padded merged weight ONCE; cache/reuse across forward calls.

    Returns (W_p, b_p, F): W_p is (Sp, Fp) in compute_dtype with S and F padded
    to multiples of 128 (zero rows/cols), b_p is (1, Fp) f32, F the true width.
    Use compute_dtype=jnp.bfloat16 for bf16 MXU compute (f32 accumulation).
    """
    W = _merge_ring_weights(factors, core, out_factor)           # (S, F)
    S, F = W.shape
    Sp, Fp = _round_up(S, 128), _round_up(F, 128)
    W_p = jnp.zeros((Sp, Fp), compute_dtype).at[:S, :F].set(W.astype(compute_dtype))
    if bias is None:
        bias = jnp.zeros((F,), jnp.float32)
    b_p = jnp.zeros((1, Fp), jnp.float32).at[0, :F].set(bias.astype(jnp.float32))
    return W_p, b_p, F


def _trl_gemm_kernel(x_ref, w_ref, b_ref, o_ref, acc_ref):
    """One (TB,TK)x(TK,TN) MXU step of y = x @ W + b with f32 accumulation."""
    k = pl.program_id(2)

    @pl.when(k == 0)
    def _():
        acc_ref[...] = jnp.zeros_like(acc_ref)

    # Cast the x tile in-kernel (VPU) to the weight compute dtype; the wrapper
    # never round-trips a cast copy of x through HBM.
    acc_ref[...] += jnp.dot(x_ref[...].astype(w_ref.dtype), w_ref[...],
                            preferred_element_type=jnp.float32)

    @pl.when(k == pl.num_programs(2) - 1)
    def _():
        o_ref[...] = (acc_ref[...] + b_ref[...]).astype(o_ref.dtype)


def trl_ringed_apply(x, W_p, b_p, out_features):
    """Pallas-backed y = x.reshape(B, S) @ W + bias with the merged weight."""
    B = x.shape[0]
    S = int(np.prod(x.shape[1:]))
    Sp, Fp = W_p.shape
    out_dtype = x.dtype

    x_flat = x.reshape(B, S)
    if Sp != S:
        # Pad the contraction dim with zero columns (exact): lane-dense x loads
        # and a full 128-multiple K feed into the MXU.
        x_flat = jnp.zeros((B, Sp), x.dtype).at[:, :S].set(x_flat)

    x_isz = jnp.dtype(x.dtype).itemsize
    w_isz = jnp.dtype(W_p.dtype).itemsize
    o_isz = jnp.dtype(out_dtype).itemsize

    # ---- generation-aware VMEM budget (v5e/v6e: 128 MiB, v7x: 64 MiB) ----
    try:
        vmem_cap = int(pltpu.get_tpu_info().vmem_capacity_bytes)
    except Exception:
        vmem_cap = 64 * 1024 * 1024
    vmem_budget = int(vmem_cap * 0.70)
    vmem_limit = int(vmem_cap * 0.875)

    # ---- tile sizing ----
    def _pack(dt):
        return max(1, 4 // jnp.dtype(dt).itemsize)
    row_mult = 8 * max(_pack(x.dtype), _pack(out_dtype))   # 8 f32 / 16 bf16 / 32 int8

    TB = min(512, _round_up(B, row_mult))
    if B >= 2 * row_mult:
        # Keep >= 2 batch grid steps so the "parallel" axis can shard over 2 TCs.
        TB = min(TB, _round_up(pl.cdiv(B, 2), row_mult))
    TN = _divisor_tile(Fp, 512)
    TK = _divisor_tile(Sp, 512)

    def _vmem_bytes(tb, tn, tk):
        return (2 * tb * tk * x_isz       # double-buffered x tiles
                + 2 * tk * tn * w_isz     # double-buffered W tiles
                + 2 * tn * 4              # double-buffered bias tiles
                + 2 * tb * tn * o_isz     # double-buffered out tiles
                + tb * tn * 4)            # f32 accumulator scratch

    while _vmem_bytes(TB, TN, TK) > vmem_budget:
        if TK > 128:
            TK = _divisor_tile(Sp, TK // 2)
        elif TN > 128:
            TN = _divisor_tile(Fp, TN // 2)
        elif TB > row_mult:
            TB = max(row_mult, _round_up(TB // 2, row_mult))
        else:
            break

    gm = pl.cdiv(B, TB)      # ragged batch tail handled by partial-block masking
    gn = Fp // TN
    gk = Sp // TK

    cost = pl.CostEstimate(
        flops=2 * B * Sp * Fp,
        transcendentals=0,
        bytes_accessed=(B * Sp * x_isz
                        + gm * Sp * Fp * w_isz   # W re-streamed per batch tile
                        + B * Fp * o_isz),
    )

    out = pl.pallas_call(
        _trl_gemm_kernel,
        out_shape=jax.ShapeDtypeStruct((B, Fp), out_dtype),
        grid_spec=pltpu.PrefetchScalarGridSpec(
            num_scalar_prefetch=0,
            grid=(gm, gn, gk),
            in_specs=[
                pl.BlockSpec((TB, TK), lambda i, j, k: (i, k)),   # x tiles
                pl.BlockSpec((TK, TN), lambda i, j, k: (k, j)),   # W tiles
                pl.BlockSpec((1, TN), lambda i, j, k: (0, j)),    # bias tile
            ],
            out_specs=pl.BlockSpec((TB, TN), lambda i, j, k: (i, j)),
            scratch_shapes=[pltpu.VMEM((TB, TN), jnp.float32)],
        ),
        compiler_params=pltpu.CompilerParams(
            dimension_semantics=("parallel", "parallel", "arbitrary"),
            vmem_limit_bytes=vmem_limit,
        ),
        cost_estimate=cost,
    )(x_flat, W_p, b_p)

    return out[:, :out_features]


def trl_ringed_forward(x, factors, core, out_factor, bias, *, compute_dtype=None):
    """Convenience one-shot forward (merges the weight per call).

    Prefer merge_trl_ringed_weights(...) once + trl_ringed_apply(...) per call
    when the factors are static (inference / constants inside a training step).
    """
    cd = compute_dtype if compute_dtype is not None else x.dtype
    W_p, b_p, F = merge_trl_ringed_weights(factors, core, out_factor, bias,
                                           compute_dtype=cd)
    return trl_ringed_apply(x, W_p, b_p, F)


if __name__ == "__main__":
    # Module hyper-parameters (small, consistent with __init__)
    input_shape = (4, 4, 4)
    input_ranks = (3, 3, 3)
    link_ranks = (2, 2, 2)
    output_features = 8
    output_rank = 5
    gain = 1.0
    B = 2

    # self.link_ranks = link_ranks[-1:] + link_ranks  (ring closure)
    ring = link_ranks[-1:] + link_ranks

    # deterministic init mirroring reset_parameters()
    fan_in = int(np.prod(input_shape))
    fan_out = output_features
    matrix_std = gain * (2.0 / (fan_in + fan_out)) ** 0.5
    # non-dangling edges: rank edges, ring link edges, core<->out_factor edge
    rank_prod = int(np.prod(input_ranks)) * int(np.prod(link_ranks)) * output_rank
    N = len(input_shape) + 2  # 3 factors + core + output_factor
    std = (matrix_std ** 2 / rank_prod) ** (0.5 / N)

    key = jax.random.PRNGKey(0)
    keys = jax.random.split(key, 7)
    factors = [
        std * jax.random.normal(
            keys[i], (input_shape[i], ring[i], ring[i + 1], input_ranks[i]), jnp.float32)
        for i in range(len(input_shape))
    ]
    core = std * jax.random.normal(keys[3], input_ranks + (output_rank,), jnp.float32)
    out_factor = std * jax.random.normal(keys[4], (output_rank, output_features), jnp.float32)
    bound = 1.0 / math.sqrt(fan_in)
    bias = jax.random.uniform(keys[5], (output_features,), jnp.float32, -bound, bound)

    # deterministic example input
    x = jax.random.normal(keys[6], (B,) + input_shape, jnp.float32)

    # Merge the weight ONCE (hoisted out of the per-call path), then run the
    # Pallas GEMM.  f32 compute here so the check against the f32 reference is
    # tight; pass compute_dtype=jnp.bfloat16 to the merge for the bf16 MXU /
    # halved HBM-traffic win on v5e/v6e/v7x (with looser tolerances).
    W_p, b_p, F = merge_trl_ringed_weights(factors, core, out_factor, bias,
                                           compute_dtype=jnp.float32)
    out = trl_ringed_apply(x, W_p, b_p, F)
    out = jax.block_until_ready(out)

    # plain-JAX reference for the full ring tensor-network contraction
    ref = jnp.einsum('bxyz,xalp,ylmq,zmar,pqrt,to->bo',
                     x, factors[0], factors[1], factors[2], core, out_factor) + bias
    assert out.shape == (B, output_features)
    np.testing.assert_allclose(np.asarray(out), np.asarray(ref), rtol=1e-4, atol=1e-4)

    # TODO(synk): masked_tensor / self.masks pruning (a no-op in the default
    # forward) is not translated; if masks become active the merged W must be
    # rebuilt whenever a mask changes.
    print("KERNEL_OK")
</pallas_src>

<mosaic_0001>
module attributes {stable_mosaic.version = 11 : i64} {
  func.func @_trl_gemm_kernel(%arg0: i32, %arg1: i32, %arg2: i32, %arg3: memref<8x128xf32, #tpu.memory_space<vmem>>, %arg4: memref<128x128xf32, #tpu.memory_space<vmem>>, %arg5: memref<1x128xf32, #tpu.memory_space<vmem>>, %arg6: memref<8x128xf32, #tpu.memory_space<vmem>>, %arg7: memref<8x128xf32, #tpu.memory_space<vmem>>) attributes {dimension_semantics = [#tpu.dimension_semantics<parallel>, #tpu.dimension_semantics<parallel>, #tpu.dimension_semantics<arbitrary>], iteration_bounds = array<i64: 1, 1, 1>, scalar_prefetch = 0 : i64, scratch_operands = 1 : i64, tpu.core_type = #tpu.core_type<tc>, window_params = [{transform_indices = @transform_0, window_bounds = array<i64: 8, 128>}, {transform_indices = @transform_1, window_bounds = array<i64: 128, 128>}, {transform_indices = @transform_2, window_bounds = array<i64: 1, 128>}, {transform_indices = @transform_3, window_bounds = array<i64: 8, 128>}]} {
    %c0_i32 = arith.constant 0 : i32
    %0 = arith.cmpi eq, %arg2, %c0_i32 : i32
    %1 = arith.extui %0 : i1 to i32
    %c0_i32_0 = arith.constant 0 : i32
    %2 = arith.cmpi ne, %1, %c0_i32_0 : i32
    scf.if %2 {
      %cst_10 = arith.constant 0.000000e+00 : f32
      %12 = vector.broadcast %cst_10 : f32 to vector<8x128xf32>
      %c0_11 = arith.constant 0 : index
      %c0_12 = arith.constant 0 : index
      %13 = vector.load %arg7[%c0_11, %c0_12] : memref<8x128xf32, #tpu.memory_space<vmem>>, vector<8x128xf32>
      tpu.vector_store %arg7[%c0_11, %c0_12], %12 {strides = array<i32>} : memref<8x128xf32, #tpu.memory_space<vmem>>, vector<8x128xf32>,
    } else {
    }
    %c0 = arith.constant 0 : index
    %c0_1 = arith.constant 0 : index
    %3 = vector.load %arg7[%c0, %c0_1] : memref<8x128xf32, #tpu.memory_space<vmem>>, vector<8x128xf32>
    %c0_2 = arith.constant 0 : index
    %c0_3 = arith.constant 0 : index
    %4 = vector.load %arg3[%c0_2, %c0_3] : memref<8x128xf32, #tpu.memory_space<vmem>>, vector<8x128xf32>
    %c0_4 = arith.constant 0 : index
    %c0_5 = arith.constant 0 : index
    %5 = vector.load %arg4[%c0_4, %c0_5] : memref<128x128xf32, #tpu.memory_space<vmem>>, vector<128x128xf32>
    %cst = arith.constant dense<0.000000e+00> : vector<8x128xf32>
    %6 = tpu.matmul %4, %5, %cst {dimension_numbers = #tpu.dot_dimension_numbers<[1], [0], [0], [1], [0, 0, 1, 1], [], []>} : vector<8x128xf32>, vector<128x128xf32>, vector<8x128xf32> -> vector<8x128xf32>
    %7 = arith.addf %3, %6 : vector<8x128xf32>
    %c0_6 = arith.constant 0 : index
    %c0_7 = arith.constant 0 : index
    %8 = vector.load %arg7[%c0_6, %c0_7] : memref<8x128xf32, #tpu.memory_space<vmem>>, vector<8x128xf32>
    tpu.vector_store %arg7[%c0_6, %c0_7], %7 {strides = array<i32>} : memref<8x128xf32, #tpu.memory_space<vmem>>, vector<8x128xf32>,
    %c0_i32_8 = arith.constant 0 : i32
    %9 = arith.cmpi eq, %arg2, %c0_i32_8 : i32
    %10 = arith.extui %9 : i1 to i32
    %c0_i32_9 = arith.constant 0 : i32
    %11 = arith.cmpi ne, %10, %c0_i32_9 : i32
    scf.if %11 {
      %c0_10 = arith.constant 0 : index
      %c0_11 = arith.constant 0 : index
      %12 = vector.load %arg7[%c0_10, %c0_11] : memref<8x128xf32, #tpu.memory_space<vmem>>, vector<8x128xf32>
      %c0_12 = arith.constant 0 : index
      %c0_13 = arith.constant 0 : index
      %13 = vector.load %arg5[%c0_12, %c0_13] : memref<1x128xf32, #tpu.memory_space<vmem>>, vector<1x128xf32>
      %14 = vector.broadcast %13 : vector<1x128xf32> to vector<8x128xf32>
      %15 = arith.addf %12, %14 : vector<8x128xf32>
      %c0_14 = arith.constant 0 : index
      %c0_15 = arith.constant 0 : index
      %16 = vector.load %arg6[%c0_14, %c0_15] : memref<8x128xf32, #tpu.memory_space<vmem>>, vector<8x128xf32>
      tpu.vector_store %arg6[%c0_14, %c0_15], %15 {strides = array<i32>} : memref<8x128xf32, #tpu.memory_space<vmem>>, vector<8x128xf32>,
    } else {
    }
    return
  }
  func.func @transform_0(%arg0: i32, %arg1: i32, %arg2: i32) -> (i32, i32) {
    %c0_i32 = arith.constant 0 : i32
    return %arg0, %arg2 : i32, i32
  }
  func.func @transform_1(%arg0: i32, %arg1: i32, %arg2: i32) -> (i32, i32) {
    %c0_i32 = arith.constant 0 : i32
    return %arg2, %arg1 : i32, i32
  }
  func.func @transform_2(%arg0: i32, %arg1: i32, %arg2: i32) -> (i32, i32) {
    %c0_i32 = arith.constant 0 : i32
    %c0_i32_0 = arith.constant 0 : i32
    return %c0_i32, %arg1 : i32, i32
  }
  func.func @transform_3(%arg0: i32, %arg1: i32, %arg2: i32) -> (i32, i32) {
    %c0_i32 = arith.constant 0 : i32
    return %arg0, %arg1 : i32, i32
  }
}

</mosaic_0001>

<bundles_post_ra>
// kernel: tpu_custom_call.1
= control target key start
LH: loop header
LB: loop body
LE: loop exit
PB: predicated region body
PF: predicated region fallthrough
CT: control target
= control target key end

     0   :  { %8 = vsyncpa [#allocation4], 0  ;;  %s344_s0 = inlined_call_operand.hbm [shape: f32[2,128], index: 0, kind: input, shape index: {}]   ;;  %s345_s1 = inlined_call_operand.hbm [shape: f32[128,128], index: 1, kind: input, shape index: {}]   ;;  %s346_s2 = inlined_call_operand.vmem [shape: f32[1,128], index: 2, kind: input, shape index: {}]   ;;  %s347_s3 = inlined_call_operand.hbm [shape: f32[2,128], index: 3, kind: output, shape index: {}]  }
   0x1   :  { %9 = vsyncpa [#allocation7], 0 }
   0x2   :  { %10 = vsyncpa [#allocation5], 0 }
   0x3   :  { %15 = vsyncadd [#allocation4], 96  ;;  %s297_s12 = smov [#allocation3]  }
   0x4   :  { %s16_s13 = sshll.u32 %s297_s12, 4  ;;  %s17_s13 = int_to_ptr.vmem [resolvable:$true] %s16_s13 }
   0x5   :  { %s239_s14 = scalar_lea.vmem %s17_s13, 32  ;;  %s243_s15 = scalar_lea.vmem %s17_s13, 128 }
   0x6   :  { %p240_p0 = scmp.ne.s32.totalorder %s17_s13, %s239_s14  ;;  %p244_p1 = scmp.lt.s32.totalorder %s17_s13, %s17_s13 }
   0x7   :  { %p245_p2 = scmp.lt.s32.totalorder %s243_s15, %s239_s14 }
   0x9   :  { %p246_p3 = por %p245_p2, %p244_p1 }
   0xb   :  { %p247_p4 = pnand %p246_p3, %p240_p0 }
   0xd   :  { %250 = shalt.err (!%p247_p4)
}
   0xe   :  { %s298_s16 = smov 32   ;;  %s299_s17 = smov 2  }
   0xf   :  { %22 = dma.hbm_to_vmem [thread:$0]  %s344_s0, 32, %s17_s13, [#allocation4], %s298_s16, %s298_s16, %s299_s17  }
  0x10   :  { %s300_s20 = smov [#allocation6]  }
  0x11   :  { %s28_s21 = sshll.u32 %s300_s20, 4  ;;  %s29_s21 = int_to_ptr.vmem [resolvable:$true] %s28_s21 }
  0x12   :  { %s259_s22 = scalar_lea.vmem %s29_s21, 2048  ;;  %p264_p6 = scmp.lt.s32.totalorder %s29_s21, %s29_s21 }
  0x13   :  { %p260_p5 = scmp.ne.s32.totalorder %s29_s21, %s259_s22  ;;  %p265_p7 = scmp.lt.s32.totalorder %s259_s22, %s259_s22 }
  0x15   :  { %p266_p8 = por %p265_p7, %p264_p6 }
  0x17   :  { %p267_p9 = pnand %p266_p8, %p260_p5 }
  0x19   :  { %270 = shalt.err (!%p267_p9)
}
  0x1a   :  { %s301_s23 = smov 128   ;;  %s302_s24 = smov 8  }
  0x1b   :  { %34 = dma.hbm_to_vmem [thread:$0]  %s345_s1, 2048, %s29_s21, [#allocation7], %s301_s23, %s301_s23, %s302_s24  }
  0x1c   :  { %291 = dma.done.wait [#allocation4], 128  }
  0x1d   :  { %292 = vsyncadd [#allocation4], 4294967168 }
  0x1e   :  { %293 = dma.done.wait [#allocation7], 2048  }
  0x1f   :  { %294 = vsyncadd [#allocation7], 4294965248  ;;  %v303_v0 = vmov 0.0   ;;  %vm304_vm0 = vmmov 0   ;;  %v65_v1 = vld [vmem:[#allocation6 + $0x78] sm:$0xff]  ;;  %v64_v2 = vld [vmem:[#allocation6 + $0x70] sm:$0xff] }
  0x20   :  { %187 = vmatprep.subr.mxu0 %v303_v0  ;;  %219 = vmatprep.mubr.msk.f32.mxu0 %vm304_vm0, %v303_v0  ;;  %v63_v3 = vld [vmem:[#allocation6 + $0x68] sm:$0xff]  ;;  %v62_v4 = vld [vmem:[#allocation6 + $0x60] sm:$0xff]  ;;  %v61_v5 = vld [vmem:[#allocation6 + $0x58] sm:$0xff] }
  0x21   :  { %188 = vmatpush3.msra.mxu0 %v65_v1  ;;  %v60_v6 = vld [vmem:[#allocation6 + $0x50] sm:$0xff]  ;;  %v59_v7 = vld [vmem:[#allocation6 + $0x48] sm:$0xff]  ;;  %v58_v8 = vld [vmem:[#allocation6 + $0x40] sm:$0xff] }
  0x22   :  { %189 = vmatprep.subr.mxu0 %v303_v0  ;;  %v57_v9 = vld [vmem:[#allocation6 + $0x38] sm:$0xff]  ;;  %v56_v10 = vld [vmem:[#allocation6 + $0x30] sm:$0xff]  ;;  %v55_v11 = vld [vmem:[#allocation6 + $0x28] sm:$0xff] }
  0x23   :  { %190 = vmatpush3.msra.mxu0 %v64_v2  ;;  %v54_v12 = vld [vmem:[#allocation6 + $0x20] sm:$0xff]  ;;  %v53_v13 = vld [vmem:[#allocation6 + $0x18] sm:$0xff]  ;;  %v52_v14 = vld [vmem:[#allocation6 + $0x10] sm:$0xff] }
  0x24   :  { %191 = vmatprep.subr.mxu0 %v303_v0  ;;  %v51_v15 = vld [vmem:[#allocation6 + $0x8] sm:$0xff]  ;;  %v50_v16 = vld [vmem:[#allocation6] sm:$0xff]  ;;  %v49_v17 = vld [vmem:[#allocation3] sm:$0xff] }
  0x25   :  { %192 = vmatpush3.msra.mxu0 %v63_v3  ;;  %v169_v18 = vld [vmem:[%s346_s2] ss:$0 sm:$0xff] }
  0x26   :  { %193 = vmatprep.subr.mxu0 %v303_v0 }
  0x27   :  { %194 = vmatpush3.msra.mxu0 %v62_v4 }
  0x28   :  { %195 = vmatprep.subr.mxu0 %v303_v0 }
  0x29   :  { %196 = vmatpush3.msra.mxu0 %v61_v5 }
  0x2a   :  { %197 = vmatprep.subr.mxu0 %v303_v0 }
  0x2b   :  { %198 = vmatpush3.msra.mxu0 %v60_v6 }
  0x2c   :  { %199 = vmatprep.subr.mxu0 %v303_v0 }
  0x2d   :  { %200 = vmatpush3.msra.mxu0 %v59_v7 }
  0x2e   :  { %201 = vmatprep.subr.mxu0 %v303_v0 }
  0x2f   :  { %202 = vmatpush3.msra.mxu0 %v58_v8 }
  0x30   :  { %203 = vmatprep.subr.mxu0 %v303_v0 }
  0x31   :  { %204 = vmatpush3.msra.mxu0 %v57_v9 }
  0x32   :  { %205 = vmatprep.subr.mxu0 %v303_v0 }
  0x33   :  { %206 = vmatpush3.msra.mxu0 %v56_v10 }
  0x34   :  { %207 = vmatprep.subr.mxu0 %v303_v0 }
  0x35   :  { %208 = vmatpush3.msra.mxu0 %v55_v11 }
  0x36   :  { %209 = vmatprep.subr.mxu0 %v303_v0 }
  0x37   :  { %210 = vmatpush3.msra.mxu0 %v54_v12 }
  0x38   :  { %211 = vmatprep.subr.mxu0 %v303_v0 }
  0x39   :  { %212 = vmatpush3.msra.mxu0 %v53_v13 }
  0x3a   :  { %213 = vmatprep.subr.mxu0 %v303_v0 }
  0x3b   :  { %214 = vmatpush3.msra.mxu0 %v52_v14 }
  0x3c   :  { %215 = vmatprep.subr.mxu0 %v303_v0 }
  0x3d   :  { %216 = vmatpush3.msra.mxu0 %v51_v15 }
  0x3e   :  { %217 = vmatprep.subr.mxu0 %v303_v0 }
  0x3f   :  { %218 = vmatpush3.msra.mxu0 %v50_v16 }
  0x40   :  { %220 = vmatmul.mubr.f32.vlgmr.msra.gmra.mxu0 %v49_v17 }
 0x100   :  { %v132_v19 = vpop.f32.mrf.mxu0 }
 0x101   :  { %v149_v20 = vadd.f32 %v169_v18, %v132_v19 }
 0x102   :  { %v221_v21 = vpop.f32.mrf.mxu0 }
 0x103   :  { %150 = vst [vmem:[#allocation8] sm:$0xff] %v149_v20 }
 0x104   :  { %155 = vsyncadd [#allocation5], 96  ;;  %s305_s27 = smov [#allocation8]  }
 0x105   :  { %s156_s28 = sshll.u32 %s305_s27, 4  ;;  %s157_s28 = int_to_ptr.vmem [resolvable:$true] %s156_s28 }
 0x106   :  { %s271_s29 = scalar_lea.vmem %s157_s28, 32  ;;  %s275_s30 = scalar_lea.vmem %s157_s28, 128 }
 0x107   :  { %p272_p10 = scmp.ne.s32.totalorder %s157_s28, %s271_s29  ;;  %p276_p11 = scmp.lt.s32.totalorder %s157_s28, %s157_s28 }
 0x108   :  { %p277_p12 = scmp.lt.s32.totalorder %s275_s30, %s271_s29 }
 0x10a   :  { %p278_p13 = por %p277_p12, %p276_p11 }
 0x10c   :  { %p279_p0 = pnand %p278_p13, %p272_p10 }
 0x10e   :  { %282 = shalt.err (!%p279_p0)
}
 0x10f   :  { %162 = dma.vmem_to_hbm [thread:$0]  %s157_s28, 32, %s347_s3, [#allocation5], %s298_s16, %s298_s16, %s299_s17  }
 0x110   :  { %295 = dma.done.wait [#allocation5], 128  }
 0x111   :  { %296 = vsyncadd [#allocation5], 4294967168 }
 0x112   :  { %166 = vsyncpa [#allocation4], 1 }
 0x113   :  { %167 = vsyncpa [#allocation7], 1 }
 0x114   :  { %168 = vsyncpa [#allocation5], 1 }

</bundles_post_ra>
